<compile_context>
chip_gen: v7x
topology: tpu7x:2x2x1
jax: 0.10.0
libtpu: 0.0.40
codegen_flags: <defaults>
</compile_context>

<pallas_src>
import functools

import jax
import jax.numpy as jnp
from jax.experimental import pallas as pl
from jax.experimental.pallas import tpu as pltpu

EPS = 1e-5


def conv_bn_relu_kernel(x_ref, w_ref, gmat_ref, gmatt_ref, gamma_ref, beta_ref,
                        out_ref, *, H):
    # x_ref     : (N*H, W*Ci)     lane-dense activations (channel innermost)
    # w_ref     : (3, W*Ci, W*Co) banded conv weight, one slab per ky tap
    # gmat_ref  : (W*Co, Co)      0/1 matrix summing the W lane-groups per channel
    # gmatt_ref : (Co, W*Co)      its transpose (per-channel -> lane broadcast)
    # gamma_ref : (1, Co)         BN weight
    # beta_ref  : (1, Co)         BN bias
    # out_ref   : (N*H, W*Co)
    NH, WCi = x_ref.shape
    Co = gamma_ref.shape[-1]
    WCo = gmat_ref.shape[0]
    W = WCo // Co

    x = x_ref[...]

    # ky = 0 / 2 taps: shift by +-1 row along the stacked (N*H) axis, zeroing
    # rows that would cross an image top/bottom boundary (the H zero-padding).
    zrow = jnp.zeros((1, WCi), jnp.float32)
    row = jax.lax.broadcasted_iota(jnp.int32, (NH, 1), 0)
    h = row % H
    x_up = jnp.concatenate([zrow, x[:NH - 1, :]], axis=0)   # row r -> x[r-1]
    x_up = jnp.where(h == 0, 0.0, x_up)                     # image top rows
    x_dn = jnp.concatenate([x[1:, :], zrow], axis=0)        # row r -> x[r+1]
    x_dn = jnp.where(h == H - 1, 0.0, x_dn)                 # image bottom rows

    # 3x3 conv (the W zero-padding is folded into the banded weight) as three
    # K = W*Ci matmuls accumulated in f32 on the MXU — no im2col concat.
    y = jnp.dot(x_up, w_ref[0], preferred_element_type=jnp.float32)
    y = y + jnp.dot(x, w_ref[1], preferred_element_type=jnp.float32)
    y = y + jnp.dot(x_dn, w_ref[2], preferred_element_type=jnp.float32)

    # BatchNorm2d with batch statistics, single pass over y.
    inv_cnt = 1.0 / (NH * W)                                # 1 / (N*H*W)
    lane_sum = jnp.sum(y, axis=0, keepdims=True)            # (1, W*Co)
    lane_sqs = jnp.sum(y * y, axis=0, keepdims=True)        # (1, W*Co)
    mean_c = jnp.dot(lane_sum, gmat_ref[...]) * inv_cnt     # (1, Co)
    var_c = jnp.dot(lane_sqs, gmat_ref[...]) * inv_cnt - mean_c * mean_c
    scale_c = gamma_ref[...] * jax.lax.rsqrt(var_c + EPS)   # (1, Co)
    shift_c = beta_ref[...] - mean_c * scale_c               # (1, Co)
    scale_l = jnp.dot(scale_c, gmatt_ref[...])               # (1, W*Co)
    shift_l = jnp.dot(shift_c, gmatt_ref[...])               # (1, W*Co)

    # ReLU + lane-dense, unmasked store.
    out_ref[...] = jnp.maximum(y * scale_l + shift_l, 0.0)


def conv_bn_relu_forward(x_nchw, w_hwio, gamma, beta):
    """ConvBNActivation forward: conv3x3(pad=1, no bias) -> BN(batch stats) -> ReLU."""
    N, Ci, H, W = x_nchw.shape
    KH, KW, wci, Co = w_hwio.shape
    assert (KH, KW) == (3, 3) and wci == Ci
    WCi, WCo = W * Ci, W * Co

    # NCHW -> NHWC -> lane-dense (N*H, W*Ci).  (In a full pipeline this layout
    # would be kept across layers instead of transposing at every boundary.)
    x = jnp.transpose(x_nchw, (0, 2, 3, 1)).astype(jnp.float32).reshape(N * H, WCi)

    # Banded block weight, one slab per ky tap:
    #   wband[ky, wi*Ci + ci, wo*Co + co] = w[ky, wi - wo + 1, ci, co]
    #                                       if 0 <= wi - wo + 1 <= 2 else 0
    kx = jnp.arange(3)[:, None, None]
    wi = jnp.arange(W)[None, :, None]
    wo = jnp.arange(W)[None, None, :]
    sel = (wi == wo + kx - 1).astype(jnp.float32)              # (3, W, W)
    wband = jnp.einsum('xab,yxio->yaibo', sel, w_hwio.astype(jnp.float32))
    wband = wband.reshape(3, WCi, WCo)                         # (3, W*Ci, W*Co)

    # 0/1 group-sum matrix (and its transpose) for per-channel BN stats in the
    # lane-dense layout.
    gmat = jnp.tile(jnp.eye(Co, dtype=jnp.float32), (W, 1))    # (W*Co, Co)
    gmat_t = gmat.T                                            # (Co, W*Co)

    gamma2 = gamma.reshape(1, Co).astype(jnp.float32)
    beta2 = beta.reshape(1, Co).astype(jnp.float32)

    vmem = pl.BlockSpec(memory_space=pltpu.MemorySpace.VMEM)
    out = pl.pallas_call(
        functools.partial(conv_bn_relu_kernel, H=H),
        out_shape=jax.ShapeDtypeStruct((N * H, WCo), jnp.float32),
        in_specs=[vmem] * 6,
        out_specs=vmem,
    )(x, wband, gmat, gmat_t, gamma2, beta2)

    # lane-dense (N*H, W*Co) -> NHWC -> NCHW
    return jnp.transpose(out.reshape(N, H, W, Co), (0, 3, 1, 2))


def ref_forward(x_nchw, w_hwio, gamma, beta):
    # Pure-JAX (XLA conv) reference for correctness checking.
    y = jax.lax.conv_general_dilated(
        x_nchw, w_hwio, window_strides=(1, 1), padding="SAME",
        dimension_numbers=("NCHW", "HWIO", "NCHW"))
    mean = jnp.mean(y, axis=(0, 2, 3), keepdims=True)
    var = jnp.mean((y - mean) ** 2, axis=(0, 2, 3), keepdims=True)   # biased
    y = (y - mean) * jax.lax.rsqrt(var + EPS) * gamma.reshape(1, -1, 1, 1) \
        + beta.reshape(1, -1, 1, 1)
    return jnp.maximum(y, 0.0)


if __name__ == "__main__":
    # Small shapes consistent with the module: batch=2, channels 16->16, 16x16.
    N, C, H, W = 2, 16, 16, 16
    key = jax.random.PRNGKey(0)
    k_x, k_w, k_g, k_b = jax.random.split(key, 4)

    x = jax.random.normal(k_x, (N, C, H, W), jnp.float32)
    w = 0.1 * jax.random.normal(k_w, (3, 3, C, C), jnp.float32)   # HWIO, bias=False
    gamma = 1.0 + 0.1 * jax.random.normal(k_g, (C,), jnp.float32)
    beta = 0.1 * jax.random.normal(k_b, (C,), jnp.float32)

    out = jax.block_until_ready(conv_bn_relu_forward(x, w, gamma, beta))
    ref = jax.block_until_ready(ref_forward(x, w, gamma, beta))

    assert out.shape == (N, C, H, W), out.shape
    max_err = float(jnp.max(jnp.abs(out - ref)))
    assert jnp.allclose(out, ref, atol=2e-3, rtol=2e-3), max_err
    print("KERNEL_OK")
</pallas_src>

<mosaic_0001>
module attributes {stable_mosaic.version = 11 : i64} {
  func.func @conv_bn_relu_kernel(%arg0: memref<32x256xf32, #tpu.memory_space<vmem>>, %arg1: memref<3x256x256xf32, #tpu.memory_space<vmem>>, %arg2: memref<256x16xf32, #tpu.memory_space<vmem>>, %arg3: memref<16x256xf32, #tpu.memory_space<vmem>>, %arg4: memref<1x16xf32, #tpu.memory_space<vmem>>, %arg5: memref<1x16xf32, #tpu.memory_space<vmem>>, %arg6: memref<32x256xf32, #tpu.memory_space<vmem>>) attributes {dimension_semantics = [], scalar_prefetch = 0 : i64, scratch_operands = 0 : i64, tpu.core_type = #tpu.core_type<tc>} {
    %c0 = arith.constant 0 : index
    %c0_0 = arith.constant 0 : index
    %0 = vector.load %arg0[%c0, %c0_0] : memref<32x256xf32, #tpu.memory_space<vmem>>, vector<32x256xf32>
    %cst = arith.constant 0.000000e+00 : f32
    %1 = vector.broadcast %cst : f32 to vector<1x256xf32>
    %2 = tpu.iota {dimensions = array<i32: 0>} : vector<32x1xi32>
    %c16_i32 = arith.constant 16 : i32
    %c0_i32 = arith.constant 0 : i32
    %3 = arith.cmpi eq, %c16_i32, %c0_i32 : i32
    %c1_i32 = arith.constant 1 : i32
    %4 = arith.select %3, %c1_i32, %c16_i32 : i32
    %5 = vector.broadcast %4 : i32 to vector<32x1xi32>
    %6 = arith.remsi %2, %5 : vector<32x1xi32>
    %c0_i32_1 = arith.constant 0 : i32
    %7 = vector.broadcast %c0_i32_1 : i32 to vector<32x1xi32>
    %8 = arith.cmpi ne, %6, %7 : vector<32x1xi32>
    %c0_i32_2 = arith.constant 0 : i32
    %9 = vector.broadcast %c0_i32_2 : i32 to vector<32x1xi32>
    %10 = arith.cmpi slt, %6, %9 : vector<32x1xi32>
    %c0_i32_3 = arith.constant 0 : i32
    %11 = arith.cmpi slt, %4, %c0_i32_3 : i32
    %12 = vector.broadcast %11 : i1 to vector<32x1xi1>
    %13 = vector.broadcast %12 : vector<32x1xi1> to vector<32x1xi1>
    %14 = arith.xori %10, %13 : vector<32x1xi1>
    %15 = arith.andi %14, %8 : vector<32x1xi1>
    %16 = vector.broadcast %4 : i32 to vector<32x1xi32>
    %17 = arith.addi %6, %16 : vector<32x1xi32>
    %18 = arith.select %15, %17, %6 : vector<32x1xi1>, vector<32x1xi32>
    %19 = vector.extract_strided_slice %0 {offsets = [0, 0], sizes = [31, 256], strides = [1, 1]} : vector<32x256xf32> to vector<31x256xf32>
    %20 = tpu.concatenate %1, %19 in 0 : vector<1x256xf32>, vector<31x256xf32> -> vector<32x256xf32>
    %c0_i32_4 = arith.constant 0 : i32
    %21 = vector.broadcast %c0_i32_4 : i32 to vector<32x1xi32>
    %22 = arith.cmpi eq, %18, %21 : vector<32x1xi32>
    %cst_5 = arith.constant 0.000000e+00 : f32
    %23 = vector.shape_cast %22 : vector<32x1xi1> to vector<32x1xi1>
    %24 = vector.broadcast %23 : vector<32x1xi1> to vector<32x256xi1>
    %25 = vector.broadcast %cst_5 : f32 to vector<32x256xf32>
    %26 = arith.select %24, %25, %20 : vector<32x256xi1>, vector<32x256xf32>
    %27 = vector.extract_strided_slice %0 {offsets = [1, 0], sizes = [31, 256], strides = [1, 1]} : vector<32x256xf32> to vector<31x256xf32>
    %28 = tpu.concatenate %27, %1 in 0 : vector<31x256xf32>, vector<1x256xf32> -> vector<32x256xf32>
    %c15_i32 = arith.constant 15 : i32
    %29 = vector.broadcast %c15_i32 : i32 to vector<32x1xi32>
    %30 = arith.cmpi eq, %18, %29 : vector<32x1xi32>
    %cst_6 = arith.constant 0.000000e+00 : f32
    %31 = vector.shape_cast %30 : vector<32x1xi1> to vector<32x1xi1>
    %32 = vector.broadcast %31 : vector<32x1xi1> to vector<32x256xi1>
    %33 = vector.broadcast %cst_6 : f32 to vector<32x256xf32>
    %34 = arith.select %32, %33, %28 : vector<32x256xi1>, vector<32x256xf32>
    %c0_7 = arith.constant 0 : index
    %c0_8 = arith.constant 0 : index
    %c0_9 = arith.constant 0 : index
    %35 = vector.load %arg1[%c0_7, %c0_8, %c0_9] : memref<3x256x256xf32, #tpu.memory_space<vmem>>, vector<1x256x256xf32>
    %36 = vector.shape_cast %35 : vector<1x256x256xf32> to vector<256x256xf32>
    %cst_10 = arith.constant dense<0.000000e+00> : vector<32x256xf32>
    %37 = tpu.matmul %26, %36, %cst_10 {dimension_numbers = #tpu.dot_dimension_numbers<[1], [0], [0], [1], [0, 0, 1, 1], [], []>} : vector<32x256xf32>, vector<256x256xf32>, vector<32x256xf32> -> vector<32x256xf32>
    %c1 = arith.constant 1 : index
    %c0_11 = arith.constant 0 : index
    %c0_12 = arith.constant 0 : index
    %38 = vector.load %arg1[%c1, %c0_11, %c0_12] : memref<3x256x256xf32, #tpu.memory_space<vmem>>, vector<1x256x256xf32>
    %39 = vector.shape_cast %38 : vector<1x256x256xf32> to vector<256x256xf32>
    %cst_13 = arith.constant dense<0.000000e+00> : vector<32x256xf32>
    %40 = tpu.matmul %0, %39, %cst_13 {dimension_numbers = #tpu.dot_dimension_numbers<[1], [0], [0], [1], [0, 0, 1, 1], [], []>} : vector<32x256xf32>, vector<256x256xf32>, vector<32x256xf32> -> vector<32x256xf32>
    %41 = arith.addf %37, %40 : vector<32x256xf32>
    %c2 = arith.constant 2 : index
    %c0_14 = arith.constant 0 : index
    %c0_15 = arith.constant 0 : index
    %42 = vector.load %arg1[%c2, %c0_14, %c0_15] : memref<3x256x256xf32, #tpu.memory_space<vmem>>, vector<1x256x256xf32>
    %43 = vector.shape_cast %42 : vector<1x256x256xf32> to vector<256x256xf32>
    %cst_16 = arith.constant dense<0.000000e+00> : vector<32x256xf32>
    %44 = tpu.matmul %34, %43, %cst_16 {dimension_numbers = #tpu.dot_dimension_numbers<[1], [0], [0], [1], [0, 0, 1, 1], [], []>} : vector<32x256xf32>, vector<256x256xf32>, vector<32x256xf32> -> vector<32x256xf32>
    %45 = arith.addf %41, %44 : vector<32x256xf32>
    %cst_17 = arith.constant dense<0.000000e+00> : vector<256xf32>
    %46 = vector.multi_reduction <add>, %45, %cst_17 [0] : vector<32x256xf32> to vector<256xf32>
    %47 = vector.shape_cast %46 : vector<256xf32> to vector<1x256xf32>
    %48 = arith.mulf %45, %45 : vector<32x256xf32>
    %cst_18 = arith.constant dense<0.000000e+00> : vector<256xf32>
    %49 = vector.multi_reduction <add>, %48, %cst_18 [0] : vector<32x256xf32> to vector<256xf32>
    %50 = vector.shape_cast %49 : vector<256xf32> to vector<1x256xf32>
    %c0_19 = arith.constant 0 : index
    %c0_20 = arith.constant 0 : index
    %51 = vector.load %arg2[%c0_19, %c0_20] : memref<256x16xf32, #tpu.memory_space<vmem>>, vector<256x16xf32>
    %cst_21 = arith.constant dense<0.000000e+00> : vector<1x16xf32>
    %52 = tpu.matmul %47, %51, %cst_21 {dimension_numbers = #tpu.dot_dimension_numbers<[1], [0], [0], [1], [0, 0, 1, 1], [], []>} : vector<1x256xf32>, vector<256x16xf32>, vector<1x16xf32> -> vector<1x16xf32>
    %cst_22 = arith.constant 0.001953125 : f32
    %53 = vector.broadcast %cst_22 : f32 to vector<1x16xf32>
    %54 = arith.mulf %52, %53 : vector<1x16xf32>
    %c0_23 = arith.constant 0 : index
    %c0_24 = arith.constant 0 : index
    %55 = vector.load %arg2[%c0_23, %c0_24] : memref<256x16xf32, #tpu.memory_space<vmem>>, vector<256x16xf32>
    %cst_25 = arith.constant dense<0.000000e+00> : vector<1x16xf32>
    %56 = tpu.matmul %50, %55, %cst_25 {dimension_numbers = #tpu.dot_dimension_numbers<[1], [0], [0], [1], [0, 0, 1, 1], [], []>} : vector<1x256xf32>, vector<256x16xf32>, vector<1x16xf32> -> vector<1x16xf32>
    %cst_26 = arith.constant 0.001953125 : f32
    %57 = vector.broadcast %cst_26 : f32 to vector<1x16xf32>
    %58 = arith.mulf %56, %57 : vector<1x16xf32>
    %59 = arith.mulf %54, %54 : vector<1x16xf32>
    %60 = arith.subf %58, %59 : vector<1x16xf32>
    %c0_27 = arith.constant 0 : index
    %c0_28 = arith.constant 0 : index
    %61 = vector.load %arg4[%c0_27, %c0_28] : memref<1x16xf32, #tpu.memory_space<vmem>>, vector<1x16xf32>
    %cst_29 = arith.constant 9.99999974E-6 : f32
    %62 = vector.broadcast %cst_29 : f32 to vector<1x16xf32>
    %63 = arith.addf %60, %62 : vector<1x16xf32>
    %64 = math.rsqrt %63 : vector<1x16xf32>
    %65 = arith.mulf %61, %64 : vector<1x16xf32>
    %c0_30 = arith.constant 0 : index
    %c0_31 = arith.constant 0 : index
    %66 = vector.load %arg5[%c0_30, %c0_31] : memref<1x16xf32, #tpu.memory_space<vmem>>, vector<1x16xf32>
    %67 = arith.mulf %54, %65 : vector<1x16xf32>
    %68 = arith.subf %66, %67 : vector<1x16xf32>
    %c0_32 = arith.constant 0 : index
    %c0_33 = arith.constant 0 : index
    %69 = vector.load %arg3[%c0_32, %c0_33] : memref<16x256xf32, #tpu.memory_space<vmem>>, vector<16x256xf32>
    %cst_34 = arith.constant dense<0.000000e+00> : vector<1x256xf32>
    %70 = tpu.matmul %65, %69, %cst_34 {dimension_numbers = #tpu.dot_dimension_numbers<[1], [0], [0], [1], [0, 0, 1, 1], [], []>} : vector<1x16xf32>, vector<16x256xf32>, vector<1x256xf32> -> vector<1x256xf32>
    %c0_35 = arith.constant 0 : index
    %c0_36 = arith.constant 0 : index
    %71 = vector.load %arg3[%c0_35, %c0_36] : memref<16x256xf32, #tpu.memory_space<vmem>>, vector<16x256xf32>
    %cst_37 = arith.constant dense<0.000000e+00> : vector<1x256xf32>
    %72 = tpu.matmul %68, %71, %cst_37 {dimension_numbers = #tpu.dot_dimension_numbers<[1], [0], [0], [1], [0, 0, 1, 1], [], []>} : vector<1x16xf32>, vector<16x256xf32>, vector<1x256xf32> -> vector<1x256xf32>
    %73 = vector.broadcast %70 : vector<1x256xf32> to vector<32x256xf32>
    %74 = arith.mulf %45, %73 : vector<32x256xf32>
    %75 = vector.broadcast %72 : vector<1x256xf32> to vector<32x256xf32>
    %76 = arith.addf %74, %75 : vector<32x256xf32>
    %cst_38 = arith.constant 0.000000e+00 : f32
    %77 = vector.broadcast %cst_38 : f32 to vector<32x256xf32>
    %78 = arith.maximumf %76, %77 : vector<32x256xf32>
    %c0_39 = arith.constant 0 : index
    %c0_40 = arith.constant 0 : index
    %79 = vector.load %arg6[%c0_39, %c0_40] : memref<32x256xf32, #tpu.memory_space<vmem>>, vector<32x256xf32>
    tpu.vector_store %arg6[%c0_39, %c0_40], %78 {strides = array<i32>} : memref<32x256xf32, #tpu.memory_space<vmem>>, vector<32x256xf32>,
    return
  }
}

</mosaic_0001>

<bundles_post_ra>
// kernel: tpu_custom_call.1
= control target key start
LH: loop header
LB: loop body
LE: loop exit
PB: predicated region body
PF: predicated region fallthrough
CT: control target
= control target key end

     0   :  { %11 = vsyncpa [#allocation3], 0  ;;  %s1945_s0 = inlined_call_operand.vmem [shape: f32[32,256], index: 0, kind: input, shape index: {}]   ;;  %s1946_s1 = inlined_call_operand.hbm [shape: f32[3,256,256], index: 1, kind: input, shape index: {}]   ;;  %s1947_s2 = inlined_call_operand.vmem [shape: f32[256,16], index: 2, kind: input, shape index: {}]   ;;  %s1948_s3 = inlined_call_operand.vmem [shape: f32[16,256], index: 3, kind: input, shape index: {}]   ;;  %s1949_s4 = inlined_call_operand.vmem [shape: f32[1,16], index: 4, kind: input, shape index: {}]   ;;  %s1950_s5 = inlined_call_operand.vmem [shape: f32[1,16], index: 5, kind: input, shape index: {}]   ;;  %s1951_s6 = inlined_call_operand.hbm [shape: f32[32,256], index: 6, kind: output, shape index: {}]  }
   0x1   :  { %12 = vsyncpa [#allocation4], 0  ;;  %s1538_s21 = smov [#allocation2]   ;;  %s1490_s25 = scalar_lea.hbm %s1946_s1, 24576 }
   0x2   :  { %s20_s22 = sshll.u32 %s1538_s21, 4  ;;  %p1491_p0 = scmp.ne.s32.totalorder %s1946_s1, %s1490_s25  ;;  %s21_s22 = int_to_ptr.vmem [resolvable:$true] %s20_s22 }
   0x3   :  { %p1494_p1 = scmp.lt.u32.totalorder %s1490_s25, %s1946_s1 }
   0x5   :  { %p1496_p2 = pnand %p1494_p1, %p1491_p0 }
   0x7   :  { %1499 = shalt.err (!%p1496_p2)
}
   0x8   :  { %s1500_s30 = scalar_lea.vmem %s21_s22, 24576  ;;  %p1505_p4 = scmp.lt.s32.totalorder %s21_s22, %s21_s22 }
   0x9   :  { %p1501_p3 = scmp.ne.s32.totalorder %s21_s22, %s1500_s30  ;;  %p1506_p5 = scmp.lt.s32.totalorder %s1500_s30, %s1500_s30 }
   0xb   :  { %p1507_p6 = por %p1506_p5, %p1505_p4 }
   0xd   :  { %p1508_p7 = pnand %p1507_p6, %p1501_p3 }
   0xf   :  { %1511 = shalt.err (!%p1508_p7)
}
  0x10   :  { %s1539_s7 = smov 256   ;;  %s1540_s8 = smov 16  }
  0x11   :  { %26 = dma.hbm_to_vmem [thread:$0]  %s1946_s1, 24576, %s21_s22, [#allocation3], %s1539_s7, %s1539_s7, %s1540_s8  }
  0x12   :  { %1534 = dma.done.wait [#allocation3], 24576  }
  0x13   :  { %1535 = vsyncadd [#allocation3], 4294942720  ;;  %v198_v0 = vld [vmem:[#allocation2 + $0x8] sm:$0xff]  ;;  %v200_v1 = vld [vmem:[#allocation2 + $0x18] sm:$0xff]  ;;  %v46_v25 = vlaneseq  ;;  %vm107_vm0 = vcmask 1040384   ;;  %vm152_vm3 = vcmask 1046528  }
  0x14   :  { %v197_v2 = vld [vmem:[#allocation2] sm:$0xff]  ;;  %v1267_v3 = vpack.c.bf16 %v200_v1, %v198_v0  ;;  %v199_v4 = vld [vmem:[#allocation2 + $0x10] sm:$0xff]  ;;  %v202_v5 = vld [vmem:[#allocation2 + $0x28] sm:$0xff]  ;;  %vm897_vm6 = vcmask 130048  }
  0x15   :  { %v204_v6 = vld [vmem:[#allocation2 + $0x38] sm:$0xff]  ;;  %v1269_v7 = vpack.c.bf16 %v199_v4, %v197_v2  ;;  %v201_v9 = vld [vmem:[#allocation2 + $0x20] sm:$0xff]  ;;  %v203_v10 = vld [vmem:[#allocation2 + $0x30] sm:$0xff]  ;;  %v1593_v32 = vshrl.u32 %v46_v25, 7 }
  0x16   :  { %v1271_v8 = vpack.c.bf16 %v204_v6, %v202_v5  ;;  %v206_v11 = vld [vmem:[#allocation2 + $0x48] sm:$0xff]  ;;  %1268 = vmatprep.subr.bf16.mxu0 %v1267_v3  ;;  %v208_v12 = vld [vmem:[#allocation2 + $0x58] sm:$0xff]  ;;  %v1273_v13 = vpack.c.bf16 %v203_v10, %v201_v9  ;;  %v205_v15 = vld [vmem:[#allocation2 + $0x40] sm:$0xff] }
  0x17   :  { %1270 = vmatpush1.bf16.msra.mxu0 %v1269_v7  ;;  %v1275_v14 = vpack.c.bf16 %v208_v12, %v206_v11  ;;  %v207_v16 = vld [vmem:[#allocation2 + $0x50] sm:$0xff]  ;;  %v210_v17 = vld [vmem:[#allocation2 + $0x68] sm:$0xff]  ;;  %v212_v18 = vld [vmem:[#allocation2 + $0x78] sm:$0xff]  ;;  %v55_v39 = vand.u32 15, %v1593_v32 }
  0x18   :  { %1272 = vmatprep.subr.bf16.mxu0 %v1271_v8  ;;  %v1277_v19 = vpack.c.bf16 %v207_v16, %v205_v15  ;;  %v1279_v20 = vpack.c.bf16 %v212_v18, %v210_v17  ;;  %v209_v21 = vld [vmem:[#allocation2 + $0x60] sm:$0xff]  ;;  %v211_v22 = vld [vmem:[#allocation2 + $0x70] sm:$0xff]  ;;  %v214_v23 = vld [vmem:[#allocation2 + $0x88] sm:$0xff] }
  0x19   :  { %v216_v24 = vld [vmem:[#allocation2 + $0x98] sm:$0xff]  ;;  %v1281_v26 = vpack.c.bf16 %v211_v22, %v209_v21  ;;  %v213_v28 = vld [vmem:[#allocation2 + $0x80] sm:$0xff]  ;;  %v215_v29 = vld [vmem:[#allocation2 + $0x90] sm:$0xff]  ;;  %vm1602_vm1 = vcmp.ne.s32.totalorder %v55_v39, 0 }
  0x1a   :  { %v1283_v27 = vpack.c.bf16 %v216_v24, %v214_v23  ;;  %v218_v30 = vld [vmem:[#allocation2 + $0xa8] sm:$0xff]  ;;  %v220_v31 = vld [vmem:[#allocation2 + $0xb8] sm:$0xff]  ;;  %v1285_v33 = vpack.c.bf16 %v215_v29, %v213_v28  ;;  %v217_v35 = vld [vmem:[#allocation2 + $0xa0] sm:$0xff] }
  0x1b   :  { %1274 = vmatpush1.bf16.msra.mxu0 %v1273_v13  ;;  %v1287_v34 = vpack.c.bf16 %v220_v31, %v218_v30  ;;  %v219_v36 = vld [vmem:[#allocation2 + $0xb0] sm:$0xff]  ;;  %v222_v37 = vld [vmem:[#allocation2 + $0xc8] sm:$0xff]  ;;  %v224_v38 = vld [vmem:[#allocation2 + $0xd8] sm:$0xff] }
  0x1c   :  { %1276 = vmatprep.subr.bf16.mxu0 %v1275_v14  ;;  %v1289_v40 = vpack.c.bf16 %v219_v36, %v217_v35  ;;  %v221_v41 = vld [vmem:[#allocation2 + $0xc0] sm:$0xff]  ;;  %v223_v42 = vld [vmem:[#allocation2 + $0xd0] sm:$0xff]  ;;  %v226_v43 = vld [vmem:[#allocation2 + $0xe8] sm:$0xff]  ;;  %v1291_v44 = vpack.c.bf16 %v224_v38, %v222_v37 }
  0x1d   :  { %v228_v45 = vld [vmem:[#allocation2 + $0xf8] sm:$0xff]  ;;  %v263_v46 = vld [vmem:[#allocation2 + $0x208] sm:$0xff]  ;;  %v262_v49 = vld [vmem:[#allocation2 + $0x200] sm:$0xff]  ;;  %v1293_v55 = vpack.c.bf16 %v223_v42, %v221_v41 }
  0x1e   :  { %v265_v47 = vld [vmem:[#allocation2 + $0x218] sm:$0xff]  ;;  %v264_v50 = vld [vmem:[#allocation2 + $0x210] sm:$0xff]  ;;  %v1599_v51 = vld [vmem:[%s1945_s0 + $0x8] sm:$0xff]  ;;  %v1295_v59 = vpack.c.bf16 %v228_v45, %v226_v43 }
  0x1f   :  { %1278 = vmatpush1.bf16.msra.mxu0 %v1277_v19  ;;  %v1203_v48 = vpack.c.bf16 %v265_v47, %v263_v46  ;;  %v1205_v52 = vpack.c.bf16 %v264_v50, %v262_v49  ;;  %v109_v53 = vrot.slane %v1599_v51, 7  ;;  %390 = vmatprep.mubr.f32.mxu1 %v1599_v51  ;;  %v225_v56 = vld [vmem:[#allocation2 + $0xe0] sm:$0xff]  ;;  %v227_v57 = vld [vmem:[#allocation2 + $0xf0] sm:$0xff]  ;;  %v267_v58 = vld [vmem:[#allocation2 + $0x228] sm:$0xff] }
  0x20   :  { %1280 = vmatprep.subr.bf16.mxu0 %v1279_v20  ;;  %v269_v61 = vld [vmem:[#allocation2 + $0x238] sm:$0xff]  ;;  %v266_v62 = vld [vmem:[#allocation2 + $0x220] sm:$0xff]  ;;  %v268_v63 = vld [vmem:[#allocation2 + $0x230] sm:$0xff]  ;;  %v1297_v6 = vpack.c.bf16 %v227_v57, %v225_v56 }
  0x21   :  { %1204 = vmatprep.subr.bf16.mxu1 %v1203_v48  ;;  %v131_v60 = vsel %vm107_vm0, 0.0, %v109_v53  ;;  %v230_v0 = vld [vmem:[#allocation2 + $0x108] sm:$0xff]  ;;  %v232_v1 = vld [vmem:[#allocation2 + $0x118] sm:$0xff]  ;;  %v1207_v2 = vpack.c.bf16 %v269_v61, %v267_v58  ;;  %v1209_v3 = vpack.c.bf16 %v268_v63, %v266_v62  ;;  %v229_v7 = vld [vmem:[#allocation2 + $0x100] sm:$0xff] }
  0x22   :  { %1206 = vmatpush1.bf16.msra.mxu1 %v1205_v52  ;;  %1112 = vmatprep.mubr.msk.f32.mxu0 %vm1602_vm1, %v131_v60  ;;  %v271_v4 = vld [vmem:[#allocation2 + $0x248] sm:$0xff]  ;;  %v273_v5 = vld [vmem:[#allocation2 + $0x258] sm:$0xff]  ;;  %v270_v9 = vld [vmem:[#allocation2 + $0x240] sm:$0xff]  ;;  %v1299_v11 = vpack.c.bf16 %v232_v1, %v230_v0 }
  0x23   :  { %1282 = vmatpush1.bf16.msra.mxu0 %v1281_v26  ;;  %1208 = vmatprep.subr.bf16.mxu1 %v1207_v2  ;;  %v1211_v8 = vpack.c.bf16 %v273_v5, %v271_v4  ;;  %v272_v10 = vld [vmem:[#allocation2 + $0x250] sm:$0xff]  ;;  %v234_v13 = vld [vmem:[#allocation2 + $0x128] sm:$0xff]  ;;  %v236_v14 = vld [vmem:[#allocation2 + $0x138] sm:$0xff] }
  0x24   :  { %1284 = vmatprep.subr.bf16.mxu0 %v1283_v27  ;;  %v231_v12 = vld [vmem:[#allocation2 + $0x110] sm:$0xff]  ;;  %v1213_v15 = vpack.c.bf16 %v272_v10, %v270_v9  ;;  %v275_v16 = vld [vmem:[#allocation2 + $0x268] sm:$0xff]  ;;  %v277_v17 = vld [vmem:[#allocation2 + $0x278] sm:$0xff]  ;;  %v1303_v24 = vpack.c.bf16 %v236_v14, %v234_v13 }
  0x25   :  { %v274_v18 = vld [vmem:[#allocation2 + $0x260] sm:$0xff]  ;;  %v1215_v19 = vpack.c.bf16 %v277_v17, %v275_v16  ;;  %v276_v20 = vld [vmem:[#allocation2 + $0x270] sm:$0xff]  ;;  %v1301_v21 = vpack.c.bf16 %v231_v12, %v229_v7  ;;  %v279_v23 = vld [vmem:[#allocation2 + $0x288] sm:$0xff] }
  0x26   :  { %1210 = vmatpush1.bf16.msra.mxu1 %v1209_v3  ;;  %v233_v22 = vld [vmem:[#allocation2 + $0x120] sm:$0xff]  ;;  %v235_v25 = vld [vmem:[#allocation2 + $0x130] sm:$0xff]  ;;  %v238_v26 = vld [vmem:[#allocation2 + $0x148] sm:$0xff]  ;;  %v1217_v27 = vpack.c.bf16 %v276_v20, %v274_v18 }
  0x27   :  { %1286 = vmatpush1.bf16.msra.mxu0 %v1285_v33  ;;  %1212 = vmatprep.subr.bf16.mxu1 %v1211_v8  ;;  %v281_v28 = vld [vmem:[#allocation2 + $0x298] sm:$0xff]  ;;  %v278_v31 = vld [vmem:[#allocation2 + $0x280] sm:$0xff]  ;;  %v280_v33 = vld [vmem:[#allocation2 + $0x290] sm:$0xff]  ;;  %v1305_v36 = vpack.c.bf16 %v235_v25, %v233_v22 }
  0x28   :  { %1288 = vmatprep.subr.bf16.mxu0 %v1287_v34  ;;  %v240_v29 = vld [vmem:[#allocation2 + $0x158] sm:$0xff]  ;;  %v1219_v30 = vpack.c.bf16 %v281_v28, %v279_v23  ;;  %v283_v34 = vld [vmem:[#allocation2 + $0x2a8] sm:$0xff]  ;;  %v237_v38 = vld [vmem:[#allocation2 + $0x140] sm:$0xff]  ;;  %v1221_v41 = vpack.c.bf16 %v280_v33, %v278_v31 }
  0x29   :  { %v285_v35 = vld [vmem:[#allocation2 + $0x2b8] sm:$0xff]  ;;  %v1307_v37 = vpack.c.bf16 %v240_v29, %v238_v26  ;;  %v239_v39 = vld [vmem:[#allocation2 + $0x150] sm:$0xff]  ;;  %v287_v46 = vld [vmem:[#allocation2 + $0x2c8] sm:$0xff] }
  0x2a   :  { %1214 = vmatpush1.bf16.msra.mxu1 %v1213_v15  ;;  %v244_v42 = vld [vmem:[#allocation2 + $0x178] sm:$0xff]  ;;  %v1223_v43 = vpack.c.bf16 %v285_v35, %v283_v34  ;;  %v284_v45 = vld [vmem:[#allocation2 + $0x2b0] sm:$0xff]  ;;  %v1309_v48 = vpack.c.bf16 %v239_v39, %v237_v38  ;;  %v241_v50 = vld [vmem:[#allocation2 + $0x160] sm:$0xff] }
  0x2b   :  { %1290 = vmatpush1.bf16.msra.mxu0 %v1289_v40  ;;  %1216 = vmatprep.subr.bf16.mxu1 %v1215_v19  ;;  %v242_v40 = vld [vmem:[#allocation2 + $0x168] sm:$0xff]  ;;  %v289_v47 = vld [vmem:[#allocation2 + $0x2d8] sm:$0xff]  ;;  %v243_v52 = vld [vmem:[#allocation2 + $0x170] sm:$0xff] }
  0x2c   :  { %1292 = vmatprep.subr.bf16.mxu0 %v1291_v44  ;;  %v282_v44 = vld [vmem:[#allocation2 + $0x2a0] sm:$0xff]  ;;  %v1311_v49 = vpack.c.bf16 %v244_v42, %v242_v40  ;;  %v248_v57 = vld [vmem:[#allocation2 + $0x198] sm:$0xff]  ;;  %v1227_v58 = vpack.c.bf16 %v289_v47, %v287_v46  ;;  %v288_v60 = vld [vmem:[#allocation2 + $0x2d0] sm:$0xff]  ;;  %v1313_v63 = vpack.c.bf16 %v243_v52, %v241_v50 }
  0x2d   :  { %v1225_v56 = vpack.c.bf16 %v284_v45, %v282_v44  ;;  %v291_v61 = vld [vmem:[#allocation2 + $0x2e8] sm:$0xff]  ;;  %v293_v62 = vld [vmem:[#allocation2 + $0x2f8] sm:$0xff]  ;;  %v245_v1 = vld [vmem:[#allocation2 + $0x180] sm:$0xff] }
  0x2e   :  { %1218 = vmatpush1.bf16.msra.mxu1 %v1217_v27  ;;  %v247_v2 = vld [vmem:[#allocation2 + $0x190] sm:$0xff]  ;;  %v250_v3 = vld [vmem:[#allocation2 + $0x1a8] sm:$0xff]  ;;  %v252_v5 = vld [vmem:[#allocation2 + $0x1b8] sm:$0xff] }
  0x2f   :  { %1294 = vmatpush1.bf16.msra.mxu0 %v1293_v55  ;;  %1220 = vmatprep.subr.bf16.mxu1 %v1219_v30  ;;  %v246_v55 = vld [vmem:[#allocation2 + $0x188] sm:$0xff]  ;;  %v290_v7 = vld [vmem:[#allocation2 + $0x2e0] sm:$0xff]  ;;  %v292_v8 = vld [vmem:[#allocation2 + $0x2f0] sm:$0xff]  ;;  %v1319_v12 = vpack.c.bf16 %v252_v5, %v250_v3 }
  0x30   :  { %1296 = vmatprep.subr.bf16.mxu0 %v1295_v59  ;;  %v286_v59 = vld [vmem:[#allocation2 + $0x2c0] sm:$0xff]  ;;  %v1315_v0 = vpack.c.bf16 %v248_v57, %v246_v55  ;;  %v295_v9 = vld [vmem:[#allocation2 + $0x308] sm:$0xff]  ;;  %v297_v10 = vld [vmem:[#allocation2 + $0x318] sm:$0xff]  ;;  %v1233_v16 = vpack.c.bf16 %v292_v8, %v290_v7  ;;  %v49_v57 = vadd.s32 16, %v1593_v32 }
  0x31   :  { %v1229_v4 = vpack.c.bf16 %v288_v60, %v286_v59  ;;  %v249_v13 = vld [vmem:[#allocation2 + $0x1a0] sm:$0xff]  ;;  %v251_v14 = vld [vmem:[#allocation2 + $0x1b0] sm:$0xff]  ;;  %v254_v15 = vld [vmem:[#allocation2 + $0x1c8] sm:$0xff]  ;;  %v1235_v18 = vpack.c.bf16 %v297_v10, %v295_v9 }
  0x32   :  { %1222 = vmatpush1.bf16.msra.mxu1 %v1221_v41  ;;  %v256_v17 = vld [vmem:[#allocation2 + $0x1d8] sm:$0xff]  ;;  %v294_v19 = vld [vmem:[#allocation2 + $0x300] sm:$0xff]  ;;  %v296_v20 = vld [vmem:[#allocation2 + $0x310] sm:$0xff]  ;;  %v1321_v23 = vpack.c.bf16 %v251_v14, %v249_v13 }
  0x33   :  { %1298 = vmatpush1.bf16.msra.mxu0 %v1297_v6  ;;  %1224 = vmatprep.subr.bf16.mxu1 %v1223_v43  ;;  %v1231_v6 = vpack.c.bf16 %v293_v62, %v291_v61  ;;  %v301_v22 = vld [vmem:[#allocation2 + $0x338] sm:$0xff]  ;;  %v253_v25 = vld [vmem:[#allocation2 + $0x1c0] sm:$0xff]  ;;  %v255_v26 = vld [vmem:[#allocation2 + $0x1d0] sm:$0xff]  ;;  %v1237_v28 = vpack.c.bf16 %v296_v20, %v294_v19 }
  0x34   :  { %1300 = vmatprep.subr.bf16.mxu0 %v1299_v11  ;;  %v1317_v11 = vpack.c.bf16 %v247_v2, %v245_v1  ;;  %v258_v27 = vld [vmem:[#allocation2 + $0x1e8] sm:$0xff]  ;;  %v260_v29 = vld [vmem:[#allocation2 + $0x1f8] sm:$0xff]  ;;  %v298_v31 = vld [vmem:[#allocation2 + $0x320] sm:$0xff] }
  0x35   :  { %v300_v33 = vld [vmem:[#allocation2 + $0x330] sm:$0xff]  ;;  %v303_v34 = vld [vmem:[#allocation2 + $0x348] sm:$0xff]  ;;  %v305_v35 = vld [vmem:[#allocation2 + $0x358] sm:$0xff]  ;;  %v1327_v39 = vpack.c.bf16 %v260_v29, %v258_v27 }
  0x36   :  { %1226 = vmatpush1.bf16.msra.mxu1 %v1225_v56  ;;  %v259_v38 = vld [vmem:[#allocation2 + $0x1f0] sm:$0xff]  ;;  %v506_v40 = vld [vmem:[#allocation2 + $0x408] sm:$0xff]  ;;  %v508_v41 = vld [vmem:[#allocation2 + $0x418] sm:$0xff]  ;;  %v1241_v43 = vpack.c.bf16 %v300_v33, %v298_v31  ;;  %v1243_v44 = vpack.c.bf16 %v305_v35, %v303_v34 }
  0x37   :  { %1302 = vmatpush1.bf16.msra.mxu0 %v1301_v21  ;;  %1228 = vmatprep.subr.bf16.mxu1 %v1227_v58  ;;  %v299_v21 = vld [vmem:[#allocation2 + $0x328] sm:$0xff]  ;;  %v1615_v42 = vld [vmem:[%s1945_s0] sm:$0xff]  ;;  %v304_v46 = vld [vmem:[#allocation2 + $0x350] sm:$0xff]  ;;  %v1331_v58 = vpack.c.bf16 %v508_v41, %v506_v40 }
  0x38   :  { %1304 = vmatprep.subr.bf16.mxu0 %v1303_v24  ;;  %v1323_v24 = vpack.c.bf16 %v256_v17, %v254_v15  ;;  %v1239_v30 = vpack.c.bf16 %v301_v22, %v299_v21  ;;  %v302_v45 = vld [vmem:[#allocation2 + $0x340] sm:$0xff]  ;;  %v1620_v47 = vld [vmem:[%s1945_s0 + $0x18] sm:$0xff]  ;;  %v108_v52 = vrot.slane %v1615_v42, 7  ;;  %v507_v56 = vld [vmem:[#allocation2 + $0x410] sm:$0xff] }
  0x39   :  { %v505_v55 = vld [vmem:[#allocation2 + $0x400] sm:$0xff]  ;;  %v510_v59 = vld [vmem:[#allocation2 + $0x428] sm:$0xff]  ;;  %v512_v60 = vld [vmem:[#allocation2 + $0x438] sm:$0xff]  ;;  %v1245_v61 = vpack.c.bf16 %v304_v46, %v302_v45  ;;  %v112_v62 = vrot.slane %v1620_v47, 7  ;;  %v156_v46 = vrot.slane %v1599_v51, 1 }
  0x3a   :  { %1230 = vmatpush1.bf16.msra.mxu1 %v1229_v4  ;;  %v306_v1 = vld [vmem:[#allocation2 + $0x360] sm:$0xff]  ;;  %v308_v2 = vld [vmem:[#allocation2 + $0x370] sm:$0xff]  ;;  %v1633_v3 = vld [vmem:[%s1945_s0 + $0x28] sm:$0xff]  ;;  %v1333_v7 = vpack.c.bf16 %v507_v56, %v505_v55 }
  0x3b   :  { %1306 = vmatpush1.bf16.msra.mxu0 %v1305_v36  ;;  %1232 = vmatprep.subr.bf16.mxu1 %v1231_v6  ;;  %v1325_v36 = vpack.c.bf16 %v255_v26, %v253_v25  ;;  %v311_v4 = vld [vmem:[#allocation2 + $0x388] sm:$0xff]  ;;  %v313_v5 = vld [vmem:[#allocation2 + $0x398] sm:$0xff]  ;;  %v130_v6 = vsel %vm107_vm0, 0.0, %v108_v52  ;;  %v509_v8 = vld [vmem:[#allocation2 + $0x420] sm:$0xff]  ;;  %v1249_v15 = vpack.c.bf16 %v308_v2, %v306_v1  ;;  %v116_v17 = vrot.slane %v1633_v3, 7 }
  0x3c   :  { %1308 = vmatprep.subr.bf16.mxu0 %v1307_v37  ;;  %v257_v37 = vld [vmem:[#allocation2 + $0x1e0] sm:$0xff]  ;;  %v511_v9 = vld [vmem:[#allocation2 + $0x430] sm:$0xff]  ;;  %v514_v13 = vld [vmem:[#allocation2 + $0x448] sm:$0xff]  ;;  %v1251_v19 = vpack.c.bf16 %v313_v5, %v311_v4 }
  0x3d   :  { %v1329_v50 = vpack.c.bf16 %v259_v38, %v257_v37  ;;  %v516_v14 = vld [vmem:[#allocation2 + $0x458] sm:$0xff]  ;;  %v310_v20 = vld [vmem:[#allocation2 + $0x380] sm:$0xff]  ;;  %v312_v21 = vld [vmem:[#allocation2 + $0x390] sm:$0xff]  ;;  %v117_v33 = vsel %vm107_vm0, %v112_v62, %v116_v17 }
  0x3e   :  { %1234 = vmatpush1.bf16.msra.mxu1 %v1233_v16  ;;  %v113_v16 = vsel %vm107_vm0, %v109_v53, %v112_v62  ;;  %v1649_v22 = vld [vmem:[%s1945_s0 + $0x38] sm:$0xff]  ;;  %v315_v53 = vld [vmem:[#allocation2 + $0x3a8] sm:$0xff]  ;;  %v513_v25 = vld [vmem:[#allocation2 + $0x440] sm:$0xff]  ;;  %v1339_v29 = vpack.c.bf16 %v516_v14, %v514_v13  ;;  %v1253_v54 = vpack.c.bf16 %v312_v21, %v310_v20 }
  0x3f   :  { %1310 = vmatpush1.bf16.msra.mxu0 %v1309_v48  ;;  %1236 = vmatprep.subr.bf16.mxu1 %v1235_v18  ;;  %v307_v48 = vld [vmem:[#allocation2 + $0x368] sm:$0xff]  ;;  %v1644_v18 = vld [vmem:[%s1945_s0 + $0x20] sm:$0xff]  ;;  %v120_v34 = vrot.slane %v1649_v22, 7  ;;  %v1664_v35 = vld [vmem:[%s1945_s0 + $0x30] sm:$0xff] }
  0x40   :  { %1312 = vmatprep.subr.bf16.mxu0 %v1311_v49  ;;  %v309_v49 = vld [vmem:[#allocation2 + $0x378] sm:$0xff]  ;;  %v518_v31 = vld [vmem:[#allocation2 + $0x468] sm:$0xff]  ;;  %v314_v38 = vld [vmem:[#allocation2 + $0x3a0] sm:$0xff]  ;;  %v118_v45 = vrot.slane %v1664_v35, 7 }
  0x41   :  { %v319_v40 = vld [vmem:[#allocation2 + $0x3c8] sm:$0xff]  ;;  %v321_v41 = vld [vmem:[#allocation2 + $0x3d8] sm:$0xff]  ;;  %v121_v56 = vsel %vm107_vm0, %v116_v17, %v120_v34  ;;  %v521_v4 = vld [vmem:[#allocation2 + $0x480] sm:$0xff] }
  0x42   :  { %1238 = vmatpush1.bf16.msra.mxu1 %v1237_v28  ;;  %v114_v28 = vrot.slane %v1644_v18, 7  ;;  %v323_v51 = vld [vmem:[#allocation2 + $0x3e8] sm:$0xff]  ;;  %v325_v62 = vld [vmem:[#allocation2 + $0x3f8] sm:$0xff]  ;;  %v523_v5 = vld [vmem:[#allocation2 + $0x490] sm:$0xff] }
  0x43   :  { %1314 = vmatpush1.bf16.msra.mxu0 %v1313_v63  ;;  %1240 = vmatprep.subr.bf16.mxu1 %v1239_v30  ;;  %v1628_v63 = vld [vmem:[%s1945_s0 + $0x10] sm:$0xff]  ;;  %v726_v13 = vld [vmem:[%s1947_s2 + $0x80] sm:$0xff]  ;;  %v727_v14 = vld [vmem:[%s1947_s2 + $0x88] sm:$0xff] }
  0x44   :  { %1316 = vmatprep.subr.bf16.mxu0 %v1315_v0  ;;  %v1247_v0 = vpack.c.bf16 %v309_v49, %v307_v48  ;;  %v110_v10 = vrot.slane %v1628_v63, 7  ;;  %v515_v30 = vld [vmem:[#allocation2 + $0x450] sm:$0xff]  ;;  %v517_v49 = vld [vmem:[#allocation2 + $0x460] sm:$0xff]  ;;  %v119_v1 = vsel %vm107_vm0, %v114_v28, %v118_v45  ;;  %v530_v21 = vld [vmem:[#allocation2 + $0x4c8] sm:$0xff] }
  0x45   :  { %v525_v17 = vld [vmem:[#allocation2 + $0x4a0] sm:$0xff]  ;;  %v531_v27 = vld [vmem:[#allocation2 + $0x4d0] sm:$0xff]  ;;  %v538_v34 = vld [vmem:[#allocation2 + $0x508] sm:$0xff] }
  0x46   :  { %1242 = vmatpush1.bf16.msra.mxu1 %v1241_v43  ;;  %v111_v26 = vsel %vm107_vm0, %v108_v52, %v110_v10  ;;  %v1341_v43 = vpack.c.bf16 %v515_v30, %v513_v25  ;;  %v522_v52 = vld [vmem:[#allocation2 + $0x488] sm:$0xff] }
  0x47   :  { %1318 = vmatpush1.bf16.msra.mxu0 %v1317_v11  ;;  %1244 = vmatprep.subr.bf16.mxu1 %v1243_v44  ;;  %v69_v11 = vand.u32 15, %v49_v57  ;;  %v115_v44 = vsel %vm107_vm0, %v110_v10, %v114_v28  ;;  %v157_v57 = vrot.slane %v1620_v47, 1  ;;  %v1263_v10 = vpack.c.bf16 %v325_v62, %v323_v51  ;;  %v534_v28 = vld [vmem:[#allocation2 + $0x4e8] sm:$0xff]  ;;  %v549_v62 = vld [vmem:[#allocation2 + $0x560] sm:$0xff] }
  0x48   :  { %1320 = vmatprep.subr.bf16.mxu0 %v1319_v12  ;;  %v1335_v12 = vpack.c.bf16 %v512_v60, %v510_v59  ;;  %v1259_v59 = vpack.c.bf16 %v321_v41, %v319_v40  ;;  %v318_v60 = vld [vmem:[#allocation2 + $0x3c0] sm:$0xff]  ;;  %v539_v40 = vld [vmem:[#allocation2 + $0x510] sm:$0xff]  ;;  %v542_v41 = vld [vmem:[#allocation2 + $0x528] sm:$0xff] }
  0x49   :  { %vm1654_vm2 = vcmp.ne.s32.totalorder %v69_v11, 0  ;;  %v322_v11 = vld [vmem:[#allocation2 + $0x3e0] sm:$0xff] }
  0x4a   :  { %1246 = vmatpush1.bf16.msra.mxu1 %v1245_v61  ;;  %v320_v61 = vld [vmem:[#allocation2 + $0x3d0] sm:$0xff] }
  0x4b   :  { %1322 = vmatpush1.bf16.msra.mxu0 %v1321_v23  ;;  %1248 = vmatprep.subr.bf16.mxu1 %v1247_v0  ;;  %v317_v23 = vld [vmem:[#allocation2 + $0x3b8] sm:$0xff] }
  0x4c   :  { %1324 = vmatprep.subr.bf16.mxu0 %v1323_v24  ;;  %v1337_v24 = vpack.c.bf16 %v511_v9, %v509_v8  ;;  %v1255_v37 = vpack.c.bf16 %v317_v23, %v315_v53  ;;  %v158_v8 = vsel %vm152_vm3, %v156_v46, %v157_v57  ;;  %v528_v9 = vld [vmem:[#allocation2 + $0x4b8] sm:$0xff]  ;;  %v1685_v23 = vpack.c.bf16 %v727_v14, %v726_v13  ;;  %v541_v46 = vld [vmem:[#allocation2 + $0x520] sm:$0xff]  ;;  %v559_v13 = vld [vmem:[#allocation2 + $0x5b0] sm:$0xff] }
  0x4d   :  { %v532_v53 = vld [vmem:[#allocation2 + $0x4d8] sm:$0xff]  ;;  %v562_v14 = vld [vmem:[#allocation2 + $0x5c8] sm:$0xff] }
  0x4e   :  { %1250 = vmatpush1.bf16.msra.mxu1 %v1249_v15  ;;  %v1349_v15 = vpack.c.bf16 %v523_v5, %v521_v4  ;;  %v1355_v25 = vpack.c.bf16 %v532_v53, %v530_v21  ;;  %v566_v21 = vld [vmem:[#allocation2 + $0x5e8] sm:$0xff]  ;;  %v568_v53 = vld [vmem:[#allocation2 + $0x5f8] sm:$0xff] }
  0x4f   :  { %1326 = vmatpush1.bf16.msra.mxu0 %v1325_v36  ;;  %v520_v36 = vld [vmem:[#allocation2 + $0x478] sm:$0xff]  ;;  %1252 = vmatprep.subr.bf16.mxu1 %v1251_v19  ;;  %v527_v19 = vld [vmem:[#allocation2 + $0x4b0] sm:$0xff] }
  0x50   :  { %1328 = vmatprep.subr.bf16.mxu0 %v1327_v39  ;;  %v316_v39 = vld [vmem:[#allocation2 + $0x3b0] sm:$0xff]  ;;  %v1343_v48 = vpack.c.bf16 %v520_v36, %v518_v31  ;;  %v540_v36 = vld [vmem:[#allocation2 + $0x518] sm:$0xff] }
  0x51   :  { %v1257_v55 = vpack.c.bf16 %v316_v39, %v314_v38  ;;  %v1363_v38 = vpack.c.bf16 %v540_v36, %v538_v34  ;;  %v537_v39 = vld [vmem:[#allocation2 + $0x500] sm:$0xff]  ;;  %v159_v36 = vrot.slane %v1644_v18, 1 }
  0x52   :  { %1254 = vmatpush1.bf16.msra.mxu1 %v1253_v54  ;;  %v533_v54 = vld [vmem:[#allocation2 + $0x4e0] sm:$0xff] }
  0x53   :  { %1330 = vmatpush1.bf16.msra.mxu0 %v1329_v50  ;;  %v519_v50 = vld [vmem:[#allocation2 + $0x470] sm:$0xff]  ;;  %1256 = vmatprep.subr.bf16.mxu1 %v1255_v37 }
  0x54   :  { %1332 = vmatprep.subr.bf16.mxu0 %v1331_v58  ;;  %v524_v58 = vld [vmem:[#allocation2 + $0x498] sm:$0xff]  ;;  %v1345_v0 = vpack.c.bf16 %v519_v50, %v517_v49  ;;  %v546_v49 = vld [vmem:[#allocation2 + $0x548] sm:$0xff] }
  0x55   :  { %v1347_v2 = vpack.c.bf16 %v524_v58, %v522_v52  ;;  %v548_v50 = vld [vmem:[#allocation2 + $0x558] sm:$0xff]  ;;  %v547_v58 = vld [vmem:[#allocation2 + $0x550] sm:$0xff] }
  0x56   :  { %1114 = vmatmul.mubr.msk.f32.vlgmr.msra.gmra.mrb[0].mxu0 %vm1602_vm1, %v130_v6  ;;  %v526_v6 = vld [vmem:[#allocation2 + $0x4a8] sm:$0xff]  ;;  %1258 = vmatpush1.bf16.msra.mxu1 %v1257_v55  ;;  %v1371_v55 = vpack.c.bf16 %v548_v50, %v546_v49  ;;  %v730_v50 = vld [vmem:[%s1947_s2 + $0xa0] sm:$0xff] }
  0x57   :  { %1334 = vmatpush1.bf16.msra.mxu0 %v1333_v7  ;;  %485 = vmatprep.mubr.f32.mxu0 %v113_v16  ;;  %v1261_v7 = vpack.c.bf16 %v320_v61, %v318_v60  ;;  %v1351_v16 = vpack.c.bf16 %v528_v9, %v526_v6  ;;  %v552_v60 = vld [vmem:[#allocation2 + $0x578] sm:$0xff]  ;;  %v553_v6 = vld [vmem:[#allocation2 + $0x580] sm:$0xff] }
  0x58   :  { %1336 = vmatprep.subr.bf16.mxu0 %v1335_v12  ;;  %1260 = vmatprep.subr.bf16.mxu1 %v1259_v59  ;;  %v324_v12 = vld [vmem:[#allocation2 + $0x3f0] sm:$0xff]  ;;  %v550_v59 = vld [vmem:[#allocation2 + $0x568] sm:$0xff]  ;;  %v560_v9 = vld [vmem:[#allocation2 + $0x5b8] sm:$0xff] }
  0x59   :  { %v1265_v20 = vpack.c.bf16 %v324_v12, %v322_v11  ;;  %v1375_v51 = vpack.c.bf16 %v552_v60, %v550_v59  ;;  %v557_v12 = vld [vmem:[#allocation2 + $0x5a0] sm:$0xff]  ;;  %v732_v60 = vld [vmem:[%s1947_s2 + $0xb0] sm:$0xff] }
  0x5a   :  { %486 = vmatmul.mubr.f32.gmra.mrb[2].mxu0 %v111_v26  ;;  %1262 = vmatpush1.bf16.msra.mxu1 %v1261_v7  ;;  %v529_v26 = vld [vmem:[#allocation2 + $0x4c0] sm:$0xff]  ;;  %v555_v7 = vld [vmem:[#allocation2 + $0x590] sm:$0xff] }
  0x5b   :  { %1338 = vmatpush1.bf16.msra.mxu0 %v1337_v24  ;;  %1116 = vmatprep.mubr.msk.f32.mxu0 %vm1654_vm2, %v117_v33  ;;  %v1353_v24 = vpack.c.bf16 %v527_v19, %v525_v17  ;;  %v1357_v30 = vpack.c.bf16 %v531_v27, %v529_v26  ;;  %v535_v33 = vld [vmem:[#allocation2 + $0x4f0] sm:$0xff]  ;;  %v561_v19 = vld [vmem:[#allocation2 + $0x5c0] sm:$0xff] }
  0x5c   :  { %1340 = vmatprep.subr.bf16.mxu0 %v1339_v29  ;;  %1264 = vmatprep.subr.bf16.mxu1 %v1263_v10  ;;  %v536_v29 = vld [vmem:[#allocation2 + $0x4f8] sm:$0xff]  ;;  %v1361_v37 = vpack.c.bf16 %v535_v33, %v533_v54  ;;  %v1381_v10 = vpack.c.bf16 %v555_v7, %v553_v6  ;;  %v565_v26 = vld [vmem:[#allocation2 + $0x5e0] sm:$0xff]  ;;  %v567_v27 = vld [vmem:[#allocation2 + $0x5f0] sm:$0xff]  ;;  %v161_v33 = vrot.slane %v1633_v3, 1 }
  0x5d   :  { %v1359_v31 = vpack.c.bf16 %v536_v29, %v534_v28  ;;  %v48_v28 = vadd.s32 8, %v1593_v32  ;;  %v153_v29 = vrot.slane %v1615_v42, 1  ;;  %v718_v6 = vld [vmem:[%s1947_s2 + $0x40] sm:$0xff]  ;;  %v719_v7 = vld [vmem:[%s1947_s2 + $0x48] sm:$0xff] }
  0x5e   :  { %1118 = vmatmul.mubr.msk.f32.gmra.mrb[4].mxu0 %vm1654_vm2, %v115_v44  ;;  %1266 = vmatpush1.bf16.msra.mxu1 %v1265_v20  ;;  %v1365_v44 = vpack.c.bf16 %v539_v40, %v537_v39  ;;  %v563_v20 = vld [vmem:[#allocation2 + $0x5d0] sm:$0xff] }
  0x5f   :  { %1342 = vmatpush1.bf16.msra.mxu0 %v1341_v43  ;;  %497 = vmatprep.mubr.f32.mxu0 %v121_v56  ;;  %v544_v43 = vld [vmem:[#allocation2 + $0x538] sm:$0xff]  ;;  %v545_v56 = vld [vmem:[#allocation2 + $0x540] sm:$0xff]  ;;  %v62_v54 = vand.u32 15, %v48_v28 }
  0x60   :  { %1344 = vmatprep.subr.bf16.mxu0 %v1343_v48  ;;  %1396 = vmatprep.subr.bf16.mxu1 %v1685_v23  ;;  %v1367_v45 = vpack.c.bf16 %v544_v43, %v542_v41  ;;  %v543_v48 = vld [vmem:[#allocation2 + $0x530] sm:$0xff]  ;;  %v1373_v61 = vpack.c.bf16 %v547_v58, %v545_v56  ;;  %v714_v56 = vld [vmem:[%s1947_s2 + $0x20] sm:$0xff]  ;;  %v715_v58 = vld [vmem:[%s1947_s2 + $0x28] sm:$0xff] }
  0x61   :  { %391 = vmatmul.mubr.f32.vlgmr.msra.gmra.mrb[0].mxu1 %v1615_v42  ;;  %v1369_v52 = vpack.c.bf16 %v543_v48, %v541_v46  ;;  %vm1131_vm4 = vcmp.ne.s32.totalorder %v62_v54, 15  ;;  %v165_v42 = vrot.slane %v1649_v22, 1  ;;  %v728_v43 = vld [vmem:[%s1947_s2 + $0x90] sm:$0xff]  ;;  %v713_v48 = vld [vmem:[%s1947_s2 + $0x18] sm:$0xff]  ;;  %v1753_v59 = vpack.c.bf16 %v715_v58, %v714_v56 }
  0x62   :  { %498 = vmatmul.mubr.f32.gmra.mrb[6].mxu0 %v119_v1  ;;  %396 = vmatprep.mubr.f32.mxu1 %v1620_v47  ;;  %v554_v1 = vld [vmem:[#allocation2 + $0x588] sm:$0xff]  ;;  %v712_v46 = vld [vmem:[%s1947_s2 + $0x10] sm:$0xff] }
  0x63   :  { %1346 = vmatpush1.bf16.msra.mxu0 %v1345_v0  ;;  %633 = vmatprep.mubr.f32.mxu0 %v158_v8  ;;  %v551_v0 = vld [vmem:[#allocation2 + $0x570] sm:$0xff]  ;;  %v558_v8 = vld [vmem:[#allocation2 + $0x5a8] sm:$0xff]  ;;  %v166_v39 = vsel %vm152_vm3, %v161_v33, %v165_v42  ;;  %v1735_v49 = vpack.c.bf16 %v713_v48, %v712_v46 }
  0x64   :  { %1348 = vmatprep.subr.bf16.mxu0 %v1347_v2  ;;  %v556_v2 = vld [vmem:[#allocation2 + $0x598] sm:$0xff]  ;;  %v1377_v4 = vpack.c.bf16 %v551_v0, %v549_v62  ;;  %v1383_v11 = vpack.c.bf16 %v560_v9, %v558_v8  ;;  %v716_v62 = vld [vmem:[%s1947_s2 + $0x30] sm:$0xff]  ;;  %v1789_v8 = vpack.c.bf16 %v719_v7, %v718_v6 }
  0x65   :  { %397 = vmatmul.mubr.f32.gmra.mrb[2].mxu1 %v1628_v63  ;;  %v1379_v5 = vpack.c.bf16 %v556_v2, %v554_v1  ;;  %v717_v0 = vld [vmem:[%s1947_s2 + $0x38] sm:$0xff]  ;;  %v734_v2 = vld [vmem:[%s1947_s2 + $0xc0] sm:$0xff]  ;;  %v736_v9 = vld [vmem:[%s1947_s2 + $0xd0] sm:$0xff] }
  0x66   :  { %402 = vmatprep.mubr.f32.mxu1 %v1633_v3  ;;  %v163_v3 = vrot.slane %v1664_v35, 1  ;;  %v1771_v1 = vpack.c.bf16 %v717_v0, %v716_v62 }
  0x67   :  { %1350 = vmatpush1.bf16.msra.mxu0 %v1349_v15  ;;  %v564_v15 = vld [vmem:[#allocation2 + $0x5d8] sm:$0xff] }
  0x68   :  { %1352 = vmatprep.subr.bf16.mxu0 %v1351_v16  ;;  %v1385_v16 = vpack.c.bf16 %v559_v13, %v557_v12  ;;  %v1387_v17 = vpack.c.bf16 %v564_v15, %v562_v14  ;;  %v164_v47 = vsel %vm152_vm3, %v159_v36, %v163_v3  ;;  %v720_v12 = vld [vmem:[%s1947_s2 + $0x50] sm:$0xff]  ;;  %v721_v13 = vld [vmem:[%s1947_s2 + $0x58] sm:$0xff]  ;;  %v738_v15 = vld [vmem:[%s1947_s2 + $0xe0] sm:$0xff] }
  0x69   :  { %403 = vmatmul.mubr.f32.gmra.mrb[4].mxu1 %v1644_v18  ;;  %v176_v18 = vsel %vm152_vm3, %v165_v42, 0.0  ;;  %v1807_v14 = vpack.c.bf16 %v721_v13, %v720_v12 }
  0x6a   :  { %408 = vmatprep.mubr.f32.mxu1 %v1649_v22  ;;  %v175_v22 = vsel %vm152_vm3, %v163_v3, 0.0 }
  0x6b   :  { %1354 = vmatpush1.bf16.msra.mxu0 %v1353_v24  ;;  %v1389_v24 = vpack.c.bf16 %v563_v20, %v561_v19  ;;  %v722_v19 = vld [vmem:[%s1947_s2 + $0x60] sm:$0xff]  ;;  %v723_v20 = vld [vmem:[%s1947_s2 + $0x68] sm:$0xff] }
  0x6c   :  { %1356 = vmatprep.subr.bf16.mxu0 %v1355_v25  ;;  %v1391_v25 = vpack.c.bf16 %v568_v53, %v566_v21  ;;  %v1825_v21 = vpack.c.bf16 %v723_v20, %v722_v19  ;;  %v740_v53 = vld [vmem:[%s1947_s2 + $0xf0] sm:$0xff] }
  0x6d   :  { %409 = vmatmul.mubr.f32.gmra.mrb[6].mxu1 %v1664_v35  ;;  %v711_v35 = vld [vmem:[%s1947_s2 + $0x8] sm:$0xff] }
  0x6f   :  { %1358 = vmatpush1.bf16.msra.mxu0 %v1357_v30  ;;  %v1393_v30 = vpack.c.bf16 %v567_v27, %v565_v26  ;;  %v724_v26 = vld [vmem:[%s1947_s2 + $0x70] sm:$0xff]  ;;  %v725_v27 = vld [vmem:[%s1947_s2 + $0x78] sm:$0xff] }
  0x70   :  { %1360 = vmatprep.subr.bf16.mxu0 %v1359_v31  ;;  %v154_v31 = vrot.slane %v1628_v63, 1  ;;  %v1843_v28 = vpack.c.bf16 %v725_v27, %v724_v26 }
  0x72   :  { %v155_v34 = vsel %vm152_vm3, %v153_v29, %v154_v31  ;;  %v160_v63 = vsel %vm152_vm3, %v154_v31, %v159_v36 }
  0x73   :  { %1362 = vmatpush1.bf16.msra.mxu0 %v1361_v37  ;;  %v162_v37 = vsel %vm152_vm3, %v157_v57, %v161_v33  ;;  %v710_v57 = vld [vmem:[%s1947_s2] sm:$0xff] }
  0x74   :  { %1364 = vmatprep.subr.bf16.mxu0 %v1363_v38  ;;  %v50_v38 = vadd.s32 24, %v1593_v32  ;;  %v1718_v41 = vpack.c.bf16 %v711_v35, %v710_v57 }
  0x76   :  { %v76_v40 = vand.u32 15, %v50_v38  ;;  %1398 = vmatpush3.bf16.msra.mxu1 %v1718_v41 }
  0x77   :  { %1366 = vmatpush1.bf16.msra.mxu0 %v1365_v44  ;;  %v729_v44 = vld [vmem:[%s1947_s2 + $0x98] sm:$0xff] }
  0x78   :  { %1368 = vmatprep.subr.bf16.mxu0 %v1367_v45  ;;  %vm1132_vm5 = vcmp.ne.s32.totalorder %v76_v40, 15  ;;  %v1727_v45 = vpack.c.bf16 %v729_v44, %v728_v43 }
  0x7a   :  { %1400 = vmatprep.subr.bf16.mxu1 %v1727_v45 }
  0x7b   :  { %1370 = vmatpush1.bf16.msra.mxu0 %v1369_v52  ;;  %1402 = vmatpush3.bf16.msra.mxu1 %v1735_v49  ;;  %v731_v52 = vld [vmem:[%s1947_s2 + $0xa8] sm:$0xff] }
  0x7c   :  { %1372 = vmatprep.subr.bf16.mxu0 %v1371_v55  ;;  %v1745_v55 = vpack.c.bf16 %v731_v52, %v730_v50 }
  0x7e   :  { %1404 = vmatprep.subr.bf16.mxu1 %v1745_v55 }
  0x7f   :  { %1374 = vmatpush1.bf16.msra.mxu0 %v1373_v61  ;;  %1406 = vmatpush3.bf16.msra.mxu1 %v1753_v59  ;;  %v733_v61 = vld [vmem:[%s1947_s2 + $0xb8] sm:$0xff] }
  0x80   :  { %1376 = vmatprep.subr.bf16.mxu0 %v1375_v51  ;;  %v1763_v51 = vpack.c.bf16 %v733_v61, %v732_v60 }
  0x82   :  { %1408 = vmatprep.subr.bf16.mxu1 %v1763_v51 }
  0x83   :  { %1378 = vmatpush1.bf16.msra.mxu0 %v1377_v4  ;;  %1410 = vmatpush3.bf16.msra.mxu1 %v1771_v1  ;;  %v735_v4 = vld [vmem:[%s1947_s2 + $0xc8] sm:$0xff] }
  0x84   :  { %1380 = vmatprep.subr.bf16.mxu0 %v1379_v5  ;;  %v1781_v5 = vpack.c.bf16 %v735_v4, %v734_v2 }
  0x86   :  { %1412 = vmatprep.subr.bf16.mxu1 %v1781_v5 }
  0x87   :  { %1382 = vmatpush1.bf16.msra.mxu0 %v1381_v10  ;;  %1414 = vmatpush3.bf16.msra.mxu1 %v1789_v8  ;;  %v737_v10 = vld [vmem:[%s1947_s2 + $0xd8] sm:$0xff] }
  0x88   :  { %1384 = vmatprep.subr.bf16.mxu0 %v1383_v11  ;;  %v1799_v11 = vpack.c.bf16 %v737_v10, %v736_v9 }
  0x8a   :  { %1416 = vmatprep.subr.bf16.mxu1 %v1799_v11 }
  0x8b   :  { %1386 = vmatpush1.bf16.msra.mxu0 %v1385_v16  ;;  %1418 = vmatpush3.bf16.msra.mxu1 %v1807_v14  ;;  %v739_v16 = vld [vmem:[%s1947_s2 + $0xe8] sm:$0xff] }
  0x8c   :  { %1388 = vmatprep.subr.bf16.mxu0 %v1387_v17  ;;  %v1817_v17 = vpack.c.bf16 %v739_v16, %v738_v15 }
  0x8e   :  { %1420 = vmatprep.subr.bf16.mxu1 %v1817_v17 }
  0x8f   :  { %1390 = vmatpush1.bf16.msra.mxu0 %v1389_v24  ;;  %1422 = vmatpush3.bf16.msra.mxu1 %v1825_v21  ;;  %v741_v24 = vld [vmem:[%s1947_s2 + $0xf8] sm:$0xff] }
  0x90   :  { %1392 = vmatprep.subr.bf16.mxu0 %v1391_v25  ;;  %v1835_v25 = vpack.c.bf16 %v741_v24, %v740_v53 }
  0x92   :  { %1424 = vmatprep.subr.bf16.mxu1 %v1835_v25 }
  0x93   :  { %1394 = vmatpush1.bf16.msra.mxu0 %v1393_v30  ;;  %1426 = vmatpush3.bf16.msra.mxu1 %v1843_v28 }
  0x94   :  { %1428 = vmatprep.subr.bf16.mxu1 %v1685_v23 }
  0x96   :  { %634 = vmatmul.mubr.f32.vlgmr.msra.gmra.mrb[0].mxu0 %v155_v34 }
  0x97   :  { %1120 = vmatprep.mubr.msk.f32.mxu0 %vm1131_vm4, %v162_v37 }
  0x9a   :  { %1122 = vmatmul.mubr.msk.f32.gmra.mrb[2].mxu0 %vm1131_vm4, %v160_v63 }
  0x9b   :  { %645 = vmatprep.mubr.f32.mxu0 %v166_v39 }
  0x9e   :  { %646 = vmatmul.mubr.f32.gmra.mrb[4].mxu0 %v164_v47 }
  0x9f   :  { %1124 = vmatprep.mubr.msk.f32.mxu0 %vm1132_vm5, %v176_v18 }
  0xa2   :  { %1126 = vmatmul.mubr.msk.f32.gmra.mrb[6].mxu0 %vm1132_vm5, %v175_v22 }
 0x134   :  { %v392_v29 = vpop.f32.mrb[0].mxu1 }
 0x135   :  { %v394_v30 = vpop.f32.mrb[1].mxu1 }
 0x138   :  { %v398_v31 = vpop.f32.mrb[2].mxu1 }
 0x139   :  { %v400_v54 = vpop.f32.mrb[3].mxu1 }
 0x13c   :  { %v404_v33 = vpop.f32.mrb[4].mxu1 }
 0x13d   :  { %v406_v34 = vpop.f32.mrb[5].mxu1 }
 0x140   :  { %v410_v36 = vpop.f32.mrb[6].mxu1 }
 0x141   :  { %v412_v37 = vpop.f32.mrb[7].mxu1 }
 0x169   :  { %v635_v42 = vpop.f32.mrb[0].mxu0 }
 0x16a   :  { %v1848_v38 = vadd.f32 %v635_v42, %v392_v29  ;;  %v637_v63 = vpop.f32.mrb[1].mxu0 }
 0x16b   :  { %v1850_v3 = vadd.f32 %v637_v63, %v394_v30 }
 0x16c   :  { %v684_v42 = vmul.f32 %v1848_v38, %v1848_v38 }
 0x16d   :  { %v641_v39 = vpop.f32.mrb[2].mxu0  ;;  %v685_v46 = vmul.f32 %v1850_v3, %v1850_v3 }
 0x16e   :  { %v1852_v40 = vadd.f32 %v641_v39, %v398_v31  ;;  %v643_v47 = vpop.f32.mrb[3].mxu0 }
 0x16f   :  { %v1854_v18 = vadd.f32 %v643_v47, %v400_v54 }
 0x170   :  { %v666_v44 = vadd.f32 %v1852_v40, %v1848_v38 }
 0x171   :  { %v647_v23 = vpop.f32.mrb[4].mxu0  ;;  %v687_v35 = vmul.f32 %v1854_v18, %v1854_v18  ;;  %v675_v48 = vadd.f32 %v1854_v18, %v1850_v3 }
 0x172   :  { %v1856_v22 = vadd.f32 %v647_v23, %v404_v33  ;;  %v649_v57 = vpop.f32.mrb[5].mxu0 }
 0x173   :  { %v1860_v43 = vadd.f32 %v649_v57, %v406_v34  ;;  %v701_v61 = vadd.f32 %v687_v35, %v685_v46  ;;  %v686_v34 = vmul.f32 %v1852_v40, %v1852_v40 }
 0x174   :  { %v667_v56 = vadd.f32 %v1856_v22, %v666_v44  ;;  %v688_v63 = vmul.f32 %v1856_v22, %v1856_v22 }
 0x175   :  { %v689_v50 = vmul.f32 %v1860_v43, %v1860_v43  ;;  %v653_v52 = vpop.f32.mrb[6].mxu0  ;;  %v676_v62 = vadd.f32 %v1860_v43, %v675_v48  ;;  %v692_v39 = vadd.f32 %v686_v34, %v684_v42 }
 0x176   :  { %v1871_v58 = vadd.f32 %v653_v52, %v410_v36  ;;  %v655_v60 = vpop.f32.mrb[7].mxu0 }
 0x177   :  { %v1874_v0 = vadd.f32 %v655_v60, %v412_v37  ;;  %v702_v4 = vadd.f32 %v701_v61, %v689_v50  ;;  %v693_v23 = vadd.f32 %v692_v39, %v688_v63 }
 0x178   :  { %v668_v2 = vadd.f32 %v1871_v58, %v667_v56  ;;  %v690_v47 = vmul.f32 %v1871_v58, %v1871_v58 }
 0x179   :  { %v677_v6 = vadd.f32 %v1874_v0, %v676_v62  ;;  %v691_v7 = vmul.f32 %v1874_v0, %v1874_v0  ;;  %v886_v62 = vld [vmem:[%s1949_s4] sm:$0x1]  ;;  %s1542_s4 = smov [#allocation5]  }
 0x17a   :  { %v669_v9 = vrot.slane %v668_v2, 4  ;;  %v694_v57 = vadd.f32 %v693_v23, %v690_v47 }
 0x17b   :  { %v678_v10 = vrot.slane %v677_v6, 4  ;;  %v703_v12 = vadd.f32 %v702_v4, %v691_v7 }
 0x17c   :  { %v670_v13 = vadd.f32 %v669_v9, %v668_v2  ;;  %v695_v35 = vrot.slane %v694_v57, 4 }
 0x17d   :  { %v679_v15 = vadd.f32 %v678_v10, %v677_v6  ;;  %v704_v16 = vrot.slane %v703_v12, 4  ;;  %v890_v6 = vld [vmem:[%s1950_s5] sm:$0x1]  ;;  %v1048_v10 = vsub.s32 0, %v1593_v32  ;;  %s1099_s5 = sshll.u32 %s1542_s4, 4  ;;  %s1100_s5 = int_to_ptr.vmem [resolvable:$true] %s1099_s5 }
 0x17e   :  { %v671_v19 = vrot.slane %v670_v13, 2  ;;  %s1512_s27 = scalar_lea.vmem %s1100_s5, 1024  ;;  %p1517_p9 = scmp.lt.s32.totalorder %s1100_s5, %s1100_s5 }
 0x17f   :  { %v680_v20 = vrot.slane %v679_v15, 2  ;;  %v705_v53 = vadd.f32 %v704_v16, %v703_v12  ;;  %p1513_p8 = scmp.ne.s32.totalorder %s1100_s5, %s1512_s27  ;;  %p1518_p10 = scmp.lt.s32.totalorder %s1512_s27, %s1512_s27 }
 0x180   :  { %v672_v24 = vadd.f32 %v671_v19, %v670_v13 }
 0x181   :  { %v681_v26 = vadd.f32 %v680_v20, %v679_v15  ;;  %v706_v27 = vrot.slane %v705_v53, 2  ;;  %p1519_p11 = por %p1518_p10, %p1517_p9 }
 0x182   :  { %v673_v29 = vrot.slane %v672_v24, 1 }
 0x183   :  { %v682_v30 = vrot.slane %v681_v26, 1  ;;  %v707_v31 = vadd.f32 %v706_v27, %v705_v53  ;;  %p1520_p12 = pnand %p1519_p11, %p1513_p8 }
 0x184   :  { %v674_v36 = vadd.f32 %v673_v29, %v672_v24 }
 0x185   :  { %v683_v54 = vadd.f32 %v682_v30, %v681_v26  ;;  %v708_v33 = vrot.slane %v707_v31, 1 }
 0x187   :  { %806 = vmatprep.mubr.f32.mxu1 %v683_v54  ;;  %v709_v37 = vadd.f32 %v708_v33, %v707_v31 }
 0x188   :  { %807 = vmatmul.mubr.f32.vlgmr.msra.gmra.mrb[8].mxu1 %v674_v36 }
 0x189   :  { %1430 = vmatpush3.bf16.msra.mxu1 %v1718_v41  ;;  %877 = vmatprep.mubr.f32.mxu1 %v709_v37  ;;  %v696_v41 = vadd.f32 %v695_v35, %v694_v57 }
 0x18a   :  { %1432 = vmatprep.subr.bf16.mxu1 %v1727_v45 }
 0x18b   :  { %v697_v44 = vrot.slane %v696_v41, 2 }
 0x18d   :  { %1434 = vmatpush3.bf16.msra.mxu1 %v1735_v49  ;;  %v698_v45 = vadd.f32 %v697_v44, %v696_v41 }
 0x18e   :  { %1436 = vmatprep.subr.bf16.mxu1 %v1745_v55 }
 0x18f   :  { %v699_v49 = vrot.slane %v698_v45, 1 }
 0x191   :  { %1438 = vmatpush3.bf16.msra.mxu1 %v1753_v59  ;;  %v700_v55 = vadd.f32 %v699_v49, %v698_v45  ;;  %v894_v59 = vld [vmem:[%s1948_s3 + $0x8] sm:$0xff] }
 0x192   :  { %1440 = vmatprep.subr.bf16.mxu1 %v1763_v51  ;;  %v896_v51 = vld [vmem:[%s1948_s3 + $0x18] sm:$0xff] }
 0x195   :  { %1442 = vmatpush3.bf16.msra.mxu1 %v1771_v1  ;;  %v893_v1 = vld [vmem:[%s1948_s3] sm:$0xff] }
 0x196   :  { %1444 = vmatprep.subr.bf16.mxu1 %v1781_v5  ;;  %v1459_v5 = vpack.c.bf16 %v896_v51, %v894_v59 }
 0x199   :  { %1446 = vmatpush3.bf16.msra.mxu1 %v1789_v8  ;;  %v895_v8 = vld [vmem:[%s1948_s3 + $0x10] sm:$0xff] }
 0x19a   :  { %1448 = vmatprep.subr.bf16.mxu1 %v1799_v11  ;;  %v1541_v11 = vmov 0.0  }
 0x19d   :  { %1450 = vmatpush3.bf16.msra.mxu1 %v1807_v14  ;;  %v1461_v14 = vpack.c.bf16 %v895_v8, %v893_v1 }
 0x19e   :  { %1452 = vmatprep.subr.bf16.mxu1 %v1817_v17 }
 0x1a1   :  { %1454 = vmatpush3.bf16.msra.mxu1 %v1825_v21 }
 0x1a2   :  { %1456 = vmatprep.subr.bf16.mxu1 %v1835_v25 }
 0x1a5   :  { %1458 = vmatpush3.bf16.msra.mxu1 %v1843_v28 }
 0x1a6   :  { %1460 = vmatprep.subr.bf16.mxu1 %v1459_v5 }
 0x1a8   :  { %878 = vmatmul.mubr.f32.vlgmr.msra.gmra.mrb[10].mxu1 %v700_v55 }
 0x1a9   :  { %965 = vmatprep.mubr.f32.mxu1 %v1541_v11  ;;  %1462 = vmatpush1.bf16.msra.mxu1 %v1461_v14 }
 0x1aa   :  { %1464 = vmatprep.subr.bf16.mxu1 %v1459_v5 }
 0x25b   :  { %v1165_v17 = vpop.f32.mrb[8].mxu1 }
 0x25c   :  { %v1166_v21 = vpop.f32.mrb[9].mxu1 }
 0x25d   :  { %v1167_v25 = vadd.f32 %v1166_v21, %v1165_v17 }
 0x25f   :  { %v812_v28 = vmul.f32 0.001953125, %v1167_v25 }
 0x261   :  { %v884_v52 = vmul.f32 %v812_v28, %v812_v28 }
 0x27b   :  { %v1200_v46 = vpop.f32.mrb[10].mxu1 }
 0x27c   :  { %v1201_v48 = vpop.f32.mrb[11].mxu1 }
 0x27d   :  { %v1202_v50 = vadd.f32 %v1201_v48, %v1200_v46 }
 0x27f   :  { %v883_v56 = vmul.f32 0.001953125, %v1202_v50 }
 0x281   :  { %v885_v60 = vsub.f32 %v883_v56, %v884_v52 }
 0x283   :  { %v887_v61 = vadd.f32 1e-05, %v885_v60 }
 0x285   :  { %1488 = vrsqrt.f32 %v887_v61 }
 0x28f   :  { %v1489_v2 = vpop.eup %1488 }
 0x290   :  { %v889_v4 = vmul.f32 %v1489_v2, %v886_v62 }
 0x292   :  { %1127 = vmatmul.mubr.msk.f32.vlgmr.msra.gmra.mrb[12].mxu1 %vm897_vm6, %v889_v4  ;;  %v891_v7 = vmul.f32 %v889_v4, %v812_v28 }
 0x293   :  { %1466 = vmatpush1.bf16.msra.mxu1 %v1461_v14  ;;  %1039 = vmatprep.mubr.f32.mxu1 %v1541_v11 }
 0x294   :  { %v892_v9 = vsub.f32 %v890_v6, %v891_v7 }
 0x296   :  { %1128 = vmatmul.mubr.msk.f32.vlgmr.msra.gmra.mrb[14].mxu1 %vm897_vm6, %v892_v9 }
 0x365   :  { %v967_v12 = vpop.f32.mrb[12].mxu1 }
 0x366   :  { %v1049_v13 = vrot.slane %v967_v12, %v1048_v10  ;;  %v969_v15 = vpop.f32.mrb[13].mxu1 }
 0x367   :  { %v1053_v16 = vrot.slane %v969_v15, %v1048_v10 }
 0x368   :  { %v1054_v19 = vmul.f32 %v1848_v38, %v1049_v13  ;;  %v1056_v20 = vmul.f32 %v1852_v40, %v1049_v13  ;;  %v1058_v24 = vmul.f32 %v1856_v22, %v1049_v13  ;;  %v1060_v26 = vmul.f32 %v1871_v58, %v1049_v13 }
 0x369   :  { %v1041_v53 = vpop.f32.mrb[14].mxu1  ;;  %v1055_v27 = vmul.f32 %v1850_v3, %v1053_v16  ;;  %v1057_v31 = vmul.f32 %v1854_v18, %v1053_v16  ;;  %v1059_v32 = vmul.f32 %v1860_v43, %v1053_v16  ;;  %v1061_v54 = vmul.f32 %v1874_v0, %v1053_v16 }
 0x36a   :  { %v1065_v29 = vrot.slane %v1041_v53, %v1048_v10  ;;  %v1043_v30 = vpop.f32.mrb[15].mxu1 }
 0x36b   :  { %v1069_v33 = vrot.slane %v1043_v30, %v1048_v10 }
 0x36c   :  { %v1070_v34 = vadd.f32 %v1065_v29, %v1054_v19  ;;  %v1072_v38 = vadd.f32 %v1065_v29, %v1056_v20  ;;  %v1074_v36 = vadd.f32 %v1065_v29, %v1058_v24  ;;  %v1076_v40 = vadd.f32 %v1065_v29, %v1060_v26 }
 0x36d   :  { %v1071_v22 = vadd.f32 %v1069_v33, %v1055_v27  ;;  %v1073_v37 = vadd.f32 %v1069_v33, %v1057_v31  ;;  %v1075_v58 = vadd.f32 %v1069_v33, %v1059_v32  ;;  %v1077_v42 = vadd.f32 %v1069_v33, %v1061_v54 }
 0x36e   :  { %v1078_v3 = vmax.f32 %v1070_v34, 0.0  ;;  %v1080_v63 = vmax.f32 %v1072_v38, 0.0  ;;  %v1082_v39 = vmax.f32 %v1074_v36, 0.0  ;;  %v1084_v47 = vmax.f32 %v1076_v40, 0.0 }
 0x36f   :  { %v1079_v18 = vmax.f32 %v1071_v22, 0.0  ;;  %v1081_v23 = vmax.f32 %v1073_v37, 0.0  ;;  %v1083_v43 = vmax.f32 %v1075_v58, 0.0  ;;  %v1085_v57 = vmax.f32 %v1077_v42, 0.0 }
 0x370   :  { %1086 = vst [vmem:[#allocation5] sm:$0xff] %v1078_v3  ;;  %1088 = vst [vmem:[#allocation5 + $0x10] sm:$0xff] %v1080_v63 }
 0x371   :  { %1090 = vst [vmem:[#allocation5 + $0x20] sm:$0xff] %v1082_v39  ;;  %1092 = vst [vmem:[#allocation5 + $0x30] sm:$0xff] %v1084_v47 }
 0x372   :  { %1087 = vst [vmem:[#allocation5 + $0x8] sm:$0xff] %v1079_v18  ;;  %1089 = vst [vmem:[#allocation5 + $0x18] sm:$0xff] %v1081_v23 }
 0x373   :  { %1091 = vst [vmem:[#allocation5 + $0x28] sm:$0xff] %v1083_v43  ;;  %1093 = vst [vmem:[#allocation5 + $0x38] sm:$0xff] %v1085_v57 }
 0x374   :  { %1523 = shalt.err (!%p1520_p12)
}
 0x375   :  { %s1524_s30 = scalar_lea.hbm %s1951_s6, 1024 }
 0x376   :  { %p1525_p13 = scmp.ne.s32.totalorder %s1951_s6, %s1524_s30  ;;  %p1528_p0 = scmp.lt.u32.totalorder %s1524_s30, %s1951_s6 }
 0x378   :  { %p1530_p1 = pnand %p1528_p0, %p1525_p13 }
 0x37a   :  { %1533 = shalt.err (!%p1530_p1)
}
 0x37b   :  { %1105 = dma.vmem_to_hbm [thread:$0]  %s1100_s5, 1024, %s1951_s6, [#allocation4], %s1539_s7, %s1539_s7, %s1540_s8  }
 0x37c   :  { %1536 = dma.done.wait [#allocation4], 1024  }
 0x37d   :  { %1537 = vsyncadd [#allocation4], 4294966272 }
 0x37e   :  { %1109 = vsyncpa [#allocation3], 1 }
 0x37f   :  { %1110 = vsyncpa [#allocation4], 1 }

</bundles_post_ra>
